<compile_context>
chip_gen: v5e
topology: v5e:2x2
jax: 0.10.0
libtpu: 0.0.40
codegen_flags: <defaults>
</compile_context>

<pallas_src>
import functools
import math

import jax
import jax.numpy as jnp
from jax.experimental import pallas as pl
from jax.experimental.pallas import tpu as pltpu

_VMEM_LIMIT = 32 * 1024 * 1024          # explicit scoped-VMEM ceiling (> v5e 16MiB default, < v7x 64MiB physical)
_VMEM_BUDGET = _VMEM_LIMIT // 2         # headroom for compiler temporaries


def _cap_tm(tm, d_model, n_pipelined_arrays, budget_bytes=_VMEM_BUDGET):
    """Cap the row tile so all double-buffered f32 tiles fit the VMEM budget."""
    per_row = n_pipelined_arrays * 2 * d_model * 4
    max_tm = max(8, (budget_bytes // per_row) // 8 * 8)
    return min(tm, max_tm)


def _row_tiling(M, tm):
    """Effective row tile (multiple of 8 sublanes) and padded row count."""
    if M >= tm:
        tm_eff = tm
    else:
        tm_eff = max(8, ((M + 7) // 8) * 8)
    M_pad = ((M + tm_eff - 1) // tm_eff) * tm_eff
    return M_pad, tm_eff


# --------------------------------------------------------------------------------------
# Kernel 1: LayerNormalization  (alpha * (x - mean) / (std + eps) + bias, std unbiased)
# --------------------------------------------------------------------------------------
def _layernorm_kernel(alpha_ref, bias_ref, x_ref, o_ref, *, eps):
    # x_ref : (TM, d_model) token tile in VMEM; alpha/bias: scalar params in SMEM.
    x = x_ref[...].astype(jnp.float32)
    n = x.shape[-1]
    mean = jnp.mean(x, axis=-1, keepdims=True)
    diff = x - mean
    # torch.std default is the unbiased estimator (ddof = 1).
    var = jnp.sum(diff * diff, axis=-1, keepdims=True) * (1.0 / (n - 1))
    std = jnp.sqrt(var)
    y = alpha_ref[0] * diff / (std + eps) + bias_ref[0]
    o_ref[...] = y.astype(o_ref.dtype)


def layer_norm(x, alpha, bias, *, eps=1e-6, tm=512):
    orig_shape = x.shape
    d_model = orig_shape[-1]
    M = math.prod(orig_shape[:-1])
    x2d = x.reshape(M, d_model)

    tm = _cap_tm(tm, d_model, n_pipelined_arrays=2)   # x tile + out tile, double-buffered
    M_pad, tm_eff = _row_tiling(M, tm)
    if M_pad != M:
        x2d = jnp.pad(x2d, ((0, M_pad - M), (0, 0)))  # zero rows are LayerNorm-safe (0/eps)

    alpha1 = jnp.asarray(alpha, jnp.float32).reshape(1)
    bias1 = jnp.asarray(bias, jnp.float32).reshape(1)

    out = pl.pallas_call(
        functools.partial(_layernorm_kernel, eps=eps),
        out_shape=jax.ShapeDtypeStruct((M_pad, d_model), x.dtype),
        grid_spec=pltpu.PrefetchScalarGridSpec(
            num_scalar_prefetch=0,
            grid=(M_pad // tm_eff,),
            in_specs=[
                pl.BlockSpec(memory_space=pltpu.MemorySpace.SMEM),   # alpha (scalar)
                pl.BlockSpec(memory_space=pltpu.MemorySpace.SMEM),   # bias  (scalar)
                pl.BlockSpec((tm_eff, d_model), lambda i: (i, 0)),   # x tile
            ],
            out_specs=pl.BlockSpec((tm_eff, d_model), lambda i: (i, 0)),
        ),
        compiler_params=pltpu.CompilerParams(
            dimension_semantics=("parallel",),
            vmem_limit_bytes=_VMEM_LIMIT,
        ),
    )(alpha1, bias1, x2d)

    if M_pad != M:
        out = out[:M]
    return out.reshape(orig_shape)


# --------------------------------------------------------------------------------------
# Kernel 2: residual add (dropout is identity in eval mode)
# --------------------------------------------------------------------------------------
def _residual_add_kernel(x_ref, s_ref, o_ref):
    o_ref[...] = (x_ref[...].astype(jnp.float32)
                  + s_ref[...].astype(jnp.float32)).astype(o_ref.dtype)


def residual_add(x, sub_out, *, tm=512):
    orig_shape = x.shape
    d_model = orig_shape[-1]
    M = math.prod(orig_shape[:-1])
    x2d = x.reshape(M, d_model)
    s2d = sub_out.reshape(M, d_model)

    tm = _cap_tm(tm, d_model, n_pipelined_arrays=3)   # x, sub_out, out tiles, double-buffered
    M_pad, tm_eff = _row_tiling(M, tm)
    if M_pad != M:
        pad = ((0, M_pad - M), (0, 0))
        x2d = jnp.pad(x2d, pad)
        s2d = jnp.pad(s2d, pad)

    out = pl.pallas_call(
        _residual_add_kernel,
        out_shape=jax.ShapeDtypeStruct((M_pad, d_model), x.dtype),
        grid_spec=pltpu.PrefetchScalarGridSpec(
            num_scalar_prefetch=0,
            grid=(M_pad // tm_eff,),
            in_specs=[
                pl.BlockSpec((tm_eff, d_model), lambda i: (i, 0)),   # x tile
                pl.BlockSpec((tm_eff, d_model), lambda i: (i, 0)),   # sublayer-out tile
            ],
            out_specs=pl.BlockSpec((tm_eff, d_model), lambda i: (i, 0)),
        ),
        compiler_params=pltpu.CompilerParams(
            dimension_semantics=("parallel",),
            vmem_limit_bytes=_VMEM_LIMIT,
        ),
    )(x2d, s2d)

    if M_pad != M:
        out = out[:M]
    return out.reshape(orig_shape)


# --------------------------------------------------------------------------------------
# ResidualConnection.forward(x, sublayer) == x + dropout(sublayer(norm(x)))
# --------------------------------------------------------------------------------------
def residual_connection(x, sublayer, alpha, bias, *, eps=1e-6, dropout_p=0.1, tm=512):
    del dropout_p  # eval-mode dropout is the identity
    normed = layer_norm(x, alpha, bias, eps=eps, tm=tm)
    sub_out = sublayer(normed)          # arbitrary user-supplied callable (plain JAX)
    return residual_add(x, sub_out, tm=tm)


if __name__ == "__main__":
    batch, seq, d_model, d_ff = 2, 8, 128, 256
    key = jax.random.PRNGKey(0)
    kx, k1, k2, k3, k4 = jax.random.split(key, 5)

    x = jax.random.normal(kx, (batch, seq, d_model), jnp.float32)

    # module params (PyTorch init: alpha = ones(1), bias = zeros(1))
    alpha = jnp.ones((1,), jnp.float32)
    bias = jnp.zeros((1,), jnp.float32)

    # a small feed-forward sublayer (arbitrary callable, as in the PyTorch API)
    lim1 = 1.0 / math.sqrt(d_model)
    lim2 = 1.0 / math.sqrt(d_ff)
    w1 = jax.random.uniform(k1, (d_model, d_ff), jnp.float32, -lim1, lim1)
    b1 = jax.random.uniform(k2, (d_ff,), jnp.float32, -lim1, lim1)
    w2 = jax.random.uniform(k3, (d_ff, d_model), jnp.float32, -lim2, lim2)
    b2 = jax.random.uniform(k4, (d_model,), jnp.float32, -lim2, lim2)

    def sublayer(y):
        return jnp.maximum(y @ w1 + b1, 0.0) @ w2 + b2

    out = residual_connection(x, sublayer, alpha, bias)
    jax.block_until_ready(out)

    # pure-JAX reference with torch semantics (unbiased std, eval-mode dropout = identity)
    eps = 1e-6
    mean = x.mean(-1, keepdims=True)
    var = ((x - mean) ** 2).sum(-1, keepdims=True) / (d_model - 1)
    std = jnp.sqrt(var)
    normed_ref = alpha[0] * (x - mean) / (std + eps) + bias[0]
    ref = x + sublayer(normed_ref)

    assert out.shape == x.shape
    assert jnp.allclose(out, ref, atol=1e-5, rtol=1e-5), float(jnp.max(jnp.abs(out - ref)))

    print("KERNEL_OK")
</pallas_src>

<mosaic_0001>
module attributes {stable_mosaic.version = 11 : i64} {
  func.func @_layernorm_kernel(%arg0: i32, %arg1: memref<1xf32, #tpu.memory_space<smem>>, %arg2: memref<1xf32, #tpu.memory_space<smem>>, %arg3: memref<16x128xf32, #tpu.memory_space<vmem>>, %arg4: memref<16x128xf32, #tpu.memory_space<vmem>>) attributes {dimension_semantics = [#tpu.dimension_semantics<parallel>], iteration_bounds = array<i64: 1>, scalar_prefetch = 0 : i64, scratch_operands = 0 : i64, tpu.core_type = #tpu.core_type<tc>, window_params = [{transform_indices = @transform_0, window_bounds = array<i64: 1>}, {transform_indices = @transform_1, window_bounds = array<i64: 1>}, {transform_indices = @transform_2, window_bounds = array<i64: 16, 128>}, {transform_indices = @transform_3, window_bounds = array<i64: 16, 128>}]} {
    %c0 = arith.constant 0 : index
    %c0_0 = arith.constant 0 : index
    %0 = vector.load %arg3[%c0, %c0_0] : memref<16x128xf32, #tpu.memory_space<vmem>>, vector<16x128xf32>
    %cst = arith.constant dense<0.000000e+00> : vector<16xf32>
    %1 = vector.multi_reduction <add>, %0, %cst [1] : vector<16x128xf32> to vector<16xf32>
    %2 = vector.shape_cast %1 : vector<16xf32> to vector<16x1xf32>
    %cst_1 = arith.constant 1.280000e+02 : f32
    %3 = vector.broadcast %cst_1 : f32 to vector<16x1xf32>
    %4 = arith.divf %2, %3 : vector<16x1xf32>
    %5 = vector.broadcast %4 : vector<16x1xf32> to vector<16x128xf32>
    %6 = arith.subf %0, %5 : vector<16x128xf32>
    %7 = arith.mulf %6, %6 : vector<16x128xf32>
    %cst_2 = arith.constant dense<0.000000e+00> : vector<16xf32>
    %8 = vector.multi_reduction <add>, %7, %cst_2 [1] : vector<16x128xf32> to vector<16xf32>
    %9 = vector.shape_cast %8 : vector<16xf32> to vector<16x1xf32>
    %cst_3 = arith.constant 0.00787401571 : f32
    %10 = vector.broadcast %cst_3 : f32 to vector<16x1xf32>
    %11 = arith.mulf %9, %10 : vector<16x1xf32>
    %12 = math.sqrt %11 : vector<16x1xf32>
    %c0_4 = arith.constant 0 : index
    %13 = memref.load %arg1[%c0_4] : memref<1xf32, #tpu.memory_space<smem>>
    %14 = vector.broadcast %13 : f32 to vector<16x128xf32>
    %15 = arith.mulf %14, %6 : vector<16x128xf32>
    %cst_5 = arith.constant 9.99999997E-7 : f32
    %16 = vector.broadcast %cst_5 : f32 to vector<16x1xf32>
    %17 = arith.addf %12, %16 : vector<16x1xf32>
    %18 = vector.broadcast %17 : vector<16x1xf32> to vector<16x128xf32>
    %19 = arith.divf %15, %18 : vector<16x128xf32>
    %c0_6 = arith.constant 0 : index
    %20 = memref.load %arg2[%c0_6] : memref<1xf32, #tpu.memory_space<smem>>
    %21 = vector.broadcast %20 : f32 to vector<16x128xf32>
    %22 = arith.addf %19, %21 : vector<16x128xf32>
    %c0_7 = arith.constant 0 : index
    %c0_8 = arith.constant 0 : index
    %23 = vector.load %arg4[%c0_7, %c0_8] : memref<16x128xf32, #tpu.memory_space<vmem>>, vector<16x128xf32>
    tpu.vector_store %arg4[%c0_7, %c0_8], %22 {strides = array<i32>} : memref<16x128xf32, #tpu.memory_space<vmem>>, vector<16x128xf32>,
    return
  }
  func.func @transform_0(%arg0: i32) -> i32 {
    %c0_i32 = arith.constant 0 : i32
    %c0_i32_0 = arith.constant 0 : i32
    return %c0_i32 : i32
  }
  func.func @transform_1(%arg0: i32) -> i32 {
    %c0_i32 = arith.constant 0 : i32
    %c0_i32_0 = arith.constant 0 : i32
    return %c0_i32 : i32
  }
  func.func @transform_2(%arg0: i32) -> (i32, i32) {
    %c0_i32 = arith.constant 0 : i32
    %c0_i32_0 = arith.constant 0 : i32
    return %arg0, %c0_i32 : i32, i32
  }
  func.func @transform_3(%arg0: i32) -> (i32, i32) {
    %c0_i32 = arith.constant 0 : i32
    %c0_i32_0 = arith.constant 0 : i32
    return %arg0, %c0_i32 : i32, i32
  }
}

</mosaic_0001>

<bundles_post_ra>
// kernel: tpu_custom_call.1
= control target key start
LH: loop header
LB: loop body
LE: loop exit
PB: predicated region body
PF: predicated region fallthrough
CT: control target
= control target key end

     0   :  { %10 = vsyncpa [#allocation5], 0  ;;  %s258_s0 = inlined_call_operand.<no memory space> [shape: f32[1], index: 0, kind: input, shape index: {}]   ;;  %s259_s1 = inlined_call_operand.<no memory space> [shape: f32[1], index: 1, kind: input, shape index: {}]   ;;  %s260_s2 = inlined_call_operand.hbm [shape: f32[16,128], index: 2, kind: input, shape index: {}]   ;;  %s261_s3 = inlined_call_operand.hbm [shape: f32[16,128], index: 3, kind: output, shape index: {}]  }
   0x1   :  { %11 = vsyncpa [#allocation6], 0  ;;  %s20_s14 = sshll.u32 %s260_s2, 4  ;;  %s210_s15 = smov [#allocation4]   ;;  %s21_s14 = int_to_ptr.hbm [resolvable:$true] %s20_s14 }
   0x2   :  { %s22_s16 = sshll.u32 %s210_s15, 4  ;;  %s211_s17 = smov 128   ;;  %s23_s16 = int_to_ptr.vmem [resolvable:$true] %s22_s16 }
   0x3   :  { %s212_s18 = smov 8  }
   0x4   :  { %28 = dma.hbm_to_vmem [thread:$0]  %s21_s14, 256, %s23_s16, [#allocation5], %s211_s17, %s211_s17, %s212_s18  }
   0x5   :  { %206 = dma.done.wait [#allocation5], 256  }
   0x6   :  { %207 = vsyncadd [#allocation5], 4294967040  ;;  %v33_v0 = vld [vmem:[#allocation4] sm:$0xff]  ;;  %v34_v1 = vld [vmem:[#allocation4 + $0x8] sm:$0xff]  ;;  %v213_v2 = vmov 128.0   ;;  %v83_v49 = vstv %s258_s0  ;;  %v119_v57 = vstv %s259_s1  ;;  %s214_s0 = smov [#allocation7]  }
   0x7   :  { %35 = vadd.xlane.f32.xlu0 %v33_v0  ;;  %148 = vrcp.f32 %v213_v2  ;;  %s128_s22 = sshll.u32 %s214_s0, 4  ;;  %s130_s24 = sshll.u32 %s261_s3, 4  ;;  %s129_s22 = int_to_ptr.vmem [resolvable:$true] %s128_s22  ;;  %s131_s24 = int_to_ptr.hbm [resolvable:$true] %s130_s24 }
   0xd   :  { %v149_v3 = vpop.eup %148 }
   0xe   :  { %v40_v4 = vmul.f32 128.0, %v149_v3  ;;  %vm44_vm0 = vweird.f32 %v149_v3 }
   0xf   :  { %37 = vadd.xlane.f32.xlu0 %v34_v1 }
  0x10   :  { %v41_v5 = vsub.f32 1.0, %v40_v4 }
  0x12   :  { %v42_v6 = vmul.f32 %v149_v3, %v41_v5 }
  0x14   :  { %v43_v7 = vadd.f32 %v149_v3, %v42_v6 }
  0x16   :  { %v45_v8 = vsel %vm44_vm0, %v149_v3, %v43_v7 }
  0x7a   :  { %v36_v9 = vpop.xlane.xlu0 %35 }
  0x7b   :  { %v46_v10 = vmul.f32 %v45_v8, %v36_v9 }
  0x7d   :  { %v48_v11 = vsub.f32 %v33_v0, %v46_v10 }
  0x7f   :  { %v50_v12 = vmul.f32 %v48_v11, %v48_v11  ;;  %v84_v53 = vmul.f32 %v83_v49, %v48_v11 }
  0x81   :  { %52 = vadd.xlane.f32.xlu1 %v50_v12 }
  0x82   :  { %v38_v13 = vpop.xlane.xlu0 %37 }
  0x83   :  { %v47_v14 = vmul.f32 %v45_v8, %v38_v13 }
  0x85   :  { %v241_v15 = vsub.f32 %v34_v1, %v47_v14 }
  0x87   :  { %v51_v16 = vmul.f32 %v241_v15, %v241_v15  ;;  %v85_v2 = vmul.f32 %v83_v49, %v241_v15 }
  0x89   :  { %54 = vadd.xlane.f32.xlu1 %v51_v16 }
  0xf4   :  { %v53_v17 = vpop.xlane.xlu1 %52 }
  0xf5   :  { %v56_v18 = vmul.f32 0.007874016, %v53_v17 }
  0xf7   :  { %150 = vrsqrt.f32 %v56_v18  ;;  %vm65_vm1 = vcmp.eq.f32.partialorder %v56_v18, inf  ;;  %v68_v31 = vand.u32 2147483648, %v56_v18  ;;  %vm67_vm2 = vcmp.eq.f32.partialorder %v56_v18, 0.0 }
  0xfc   :  { %v55_v19 = vpop.xlane.xlu1 %54 }
  0xfd   :  { %v151_v20 = vpop.eup %150  ;;  %v57_v21 = vmul.f32 0.007874016, %v55_v19 }
  0xfe   :  { %v59_v22 = vmul.f32 %v151_v20, %v56_v18 }
  0xff   :  { %152 = vrsqrt.f32 %v57_v21  ;;  %vm77_vm3 = vcmp.eq.f32.partialorder %v57_v21, inf  ;;  %v80_v39 = vand.u32 2147483648, %v57_v21  ;;  %vm79_vm4 = vcmp.eq.f32.partialorder %v57_v21, 0.0 }
 0x100   :  { %v60_v23 = vmul.f32 %v151_v20, %v59_v22 }
 0x102   :  { %v61_v24 = vmul.f32 0.5, %v60_v23 }
 0x104   :  { %v62_v25 = vsub.f32 1.5, %v61_v24 }
 0x105   :  { %v153_v26 = vpop.eup %152 }
 0x106   :  { %v63_v27 = vmul.f32 %v151_v20, %v62_v25  ;;  %v71_v28 = vmul.f32 %v153_v26, %v57_v21 }
 0x108   :  { %v64_v29 = vmul.f32 %v63_v27, %v56_v18  ;;  %v72_v30 = vmul.f32 %v153_v26, %v71_v28 }
 0x10a   :  { %v66_v32 = vsel %vm65_vm1, %v56_v18, %v64_v29  ;;  %v73_v33 = vmul.f32 0.5, %v72_v30 }
 0x10b   :  { %v69_v34 = vsel %vm67_vm2, %v68_v31, %v66_v32 }
 0x10c   :  { %v74_v35 = vsub.f32 1.5, %v73_v33  ;;  %v86_v36 = vadd.f32 1e-06, %v69_v34 }
 0x10e   :  { %v75_v37 = vmul.f32 %v153_v26, %v74_v35  ;;  %154 = vrcp.f32 %v86_v36  ;;  %v99_v46 = vand.u32 2147483648, %v86_v36  ;;  %v97_v48 = vand.u32 2147483647, %v86_v36 }
 0x10f   :  { %vm93_vm6 = vweird.f32 %v86_v36 }
 0x110   :  { %v76_v38 = vmul.f32 %v75_v37, %v57_v21  ;;  %v100_v52 = vor.u32 1.1754944e-38, %v99_v46  ;;  %vm98_vm8 = vcmp.eq.f32.partialorder %v97_v48, 8.507059e+37 }
 0x112   :  { %v78_v40 = vsel %vm77_vm3, %v57_v21, %v76_v38 }
 0x113   :  { %v81_v41 = vsel %vm79_vm4, %v80_v39, %v78_v40 }
 0x114   :  { %v155_v42 = vpop.eup %154  ;;  %v87_v43 = vadd.f32 1e-06, %v81_v41 }
 0x115   :  { %v89_v44 = vmul.f32 %v155_v42, %v86_v36  ;;  %vm94_vm5 = vweird.f32 %v155_v42 }
 0x116   :  { %156 = vrcp.f32 %v87_v43  ;;  %vm95_vm7 = vmor %vm93_vm6, %vm94_vm5  ;;  %v114_v60 = vand.u32 2147483648, %v87_v43  ;;  %v112_v62 = vand.u32 2147483647, %v87_v43  ;;  %vm108_vm10 = vweird.f32 %v87_v43 }
 0x117   :  { %v90_v45 = vsub.f32 1.0, %v89_v44 }
 0x118   :  { %v115_v1 = vor.u32 1.1754944e-38, %v114_v60  ;;  %vm113_vm12 = vcmp.eq.f32.partialorder %v112_v62, 8.507059e+37 }
 0x119   :  { %v91_v47 = vmul.f32 %v155_v42, %v90_v45 }
 0x11b   :  { %v92_v50 = vadd.f32 %v155_v42, %v91_v47 }
 0x11c   :  { %v157_v51 = vpop.eup %156 }
 0x11d   :  { %v96_v54 = vsel %vm95_vm7, %v155_v42, %v92_v50  ;;  %v104_v55 = vmul.f32 %v157_v51, %v87_v43  ;;  %vm109_vm9 = vweird.f32 %v157_v51 }
 0x11e   :  { %v101_v56 = vsel %vm98_vm8, %v100_v52, %v96_v54  ;;  %vm110_vm11 = vmor %vm108_vm10, %vm109_vm9 }
 0x11f   :  { %v102_v58 = vmul.f32 %v101_v56, %v84_v53  ;;  %v105_v59 = vsub.f32 1.0, %v104_v55 }
 0x121   :  { %v106_v61 = vmul.f32 %v157_v51, %v105_v59  ;;  %v120_v63 = vadd.f32 %v119_v57, %v102_v58 }
 0x123   :  { %v107_v0 = vadd.f32 %v157_v51, %v106_v61  ;;  %122 = vst [vmem:[#allocation7] sm:$0xff] %v120_v63 }
 0x125   :  { %v111_v3 = vsel %vm110_vm11, %v157_v51, %v107_v0 }
 0x126   :  { %v116_v4 = vsel %vm113_vm12, %v115_v1, %v111_v3 }
 0x127   :  { %v117_v5 = vmul.f32 %v116_v4, %v85_v2 }
 0x129   :  { %v121_v6 = vadd.f32 %v119_v57, %v117_v5 }
 0x12b   :  { %123 = vst [vmem:[#allocation7 + $0x8] sm:$0xff] %v121_v6 }
 0x12c   :  { %136 = dma.vmem_to_hbm [thread:$0]  %s129_s22, 256, %s131_s24, [#allocation6], %s211_s17, %s211_s17, %s212_s18  }
 0x12d   :  { %208 = dma.done.wait [#allocation6], 256  }
 0x12e   :  { %209 = vsyncadd [#allocation6], 4294967040 }
 0x12f   :  { %141 = vsyncpa [#allocation5], 1 }
 0x130   :  { %142 = vsyncpa [#allocation6], 1 }

</bundles_post_ra>
